<compile_context>
chip_gen: v7x
topology: tpu7x:2x2x1
jax: 0.10.0
libtpu: 0.0.40
codegen_flags: <defaults>
</compile_context>

<pallas_src>
import functools
import math

import jax
import jax.numpy as jnp
import numpy as np
from jax.experimental import pallas as pl
from jax.experimental.pallas import tpu as pltpu


def _round_up(x, m):
    return ((x + m - 1) // m) * m


def _subcenter_arcface_kernel(
    hit_ref,      # SMEM (nbt, nct) int32 : 1 if this (B-tile, C-tile) contains a label
    e_ref,        # VMEM (TB, D)          : pre-normalized embeddings tile
    w_ref,        # VMEM (D, k*TC)        : pre-normalized weight tile (fused sub-centers)
    labels_ref,   # VMEM (TB, 1)  int32
    out_ref,      # VMEM (TB, TC)
    *, s, cos_m, sin_m, k, tc, dot_dtype,
):
    i = pl.program_id(0)
    j = pl.program_id(1)

    e = e_ref[...].astype(dot_dtype)
    w = w_ref[...].astype(dot_dtype)

    # Single wide MXU matmul over all k sub-centers at once: (TB, D) x (D, k*TC).
    cos_all = jnp.dot(e, w, preferred_element_type=jnp.float32)  # (TB, k*TC)

    # max over the k sub-centers (contiguous, lane-aligned TC-wide slices).
    cos_max = cos_all[:, 0:tc]
    for kk in range(1, k):
        cos_max = jnp.maximum(cos_max, cos_all[:, kk * tc:(kk + 1) * tc])

    has_hit = hit_ref[i, j] > 0

    # Common case (no label falls in this class tile): plain scaled cosine,
    # single store, no transcendental/margin math at all.
    @pl.when(jnp.logical_not(has_hit))
    def _():
        out_ref[...] = (s * cos_max).astype(out_ref.dtype)

    # Margin math only for tiles whose class range contains at least one label.
    @pl.when(has_hit)
    def _():
        # target = cos(acos(clip(c)) + m) = c*cos(m) - sqrt(1 - c^2)*sin(m)
        # (trig identity; mathematically identical on the clipped range).
        c = jnp.clip(cos_max, -1.0 + 1e-7, 1.0 - 1e-7)
        target = c * cos_m - jnp.sqrt(1.0 - c * c) * sin_m
        labels = labels_ref[...]                                   # (TB, 1) int32
        col = jax.lax.broadcasted_iota(jnp.int32, cos_max.shape, 1) + j * tc
        out_ref[...] = jnp.where(
            col == labels, s * target, s * cos_max
        ).astype(out_ref.dtype)


def subcenter_arcface_forward(
    embeddings, weight, labels, *, s=50.0, m=0.5, tb=None, tc=None,
    dot_dtype=jnp.float32,
):
    """embeddings: (B, D), weight: (C, k, D), labels: (B,) int -> (B, C) logits."""
    B, D = embeddings.shape
    C, K, _ = weight.shape

    # --- tile sizes (lane-dense output, sublane-aligned batch) ----------------
    tb = min(128, _round_up(B, 8)) if tb is None else _round_up(tb, 8)
    tc = min(512, _round_up(C, 128)) if tc is None else _round_up(tc, 128)
    B_pad = _round_up(B, tb)
    C_pad = _round_up(C, tc)
    nbt, nct = B_pad // tb, C_pad // tc

    # --- hoisted normalization (once, in XLA; not per grid tile) --------------
    e32 = embeddings.astype(jnp.float32)
    e_norm = e32 * jax.lax.rsqrt(
        jnp.maximum(jnp.sum(e32 * e32, axis=-1, keepdims=True), 1e-24)
    )
    w32 = weight.astype(jnp.float32)
    w_norm = w32 * jax.lax.rsqrt(
        jnp.maximum(jnp.sum(w32 * w32, axis=-1, keepdims=True), 1e-24)
    )

    # --- padding ---------------------------------------------------------------
    labels_i = labels.astype(jnp.int32)
    if B_pad != B:
        e_norm = jnp.pad(e_norm, ((0, B_pad - B), (0, 0)))
        labels_i = jnp.pad(labels_i, (0, B_pad - B), constant_values=C_pad)
    if C_pad != C:
        w_norm = jnp.pad(w_norm, ((0, C_pad - C), (0, 0), (0, 0)))

    # --- weight tile layout: (nct, D, k*TC), contraction dim second-to-last ---
    # TODO(synk): in a real training loop, cache this tile-major layout with the
    # parameter instead of re-materializing it every forward call.
    w_tiles = (
        w_norm.reshape(nct, tc, K, D).transpose(0, 3, 2, 1).reshape(nct, D, K * tc)
    )

    labels2d = labels_i.reshape(B_pad, 1)

    # --- per-(B-tile, C-tile) label-hit table (scalar prefetch -> SMEM) --------
    lab_ctile = labels_i.reshape(nbt, tb) // tc                       # (nbt, tb)
    hit = jnp.any(
        lab_ctile[:, :, None] == jnp.arange(nct, dtype=jnp.int32)[None, None, :],
        axis=1,
    ).astype(jnp.int32)                                               # (nbt, nct)

    kernel = functools.partial(
        _subcenter_arcface_kernel,
        s=float(s), cos_m=math.cos(m), sin_m=math.sin(m),
        k=K, tc=tc, dot_dtype=dot_dtype,
    )

    grid_spec = pltpu.PrefetchScalarGridSpec(
        num_scalar_prefetch=1,
        grid=(nbt, nct),
        in_specs=[
            pl.BlockSpec((tb, D), lambda i, j, hit_ref: (i, 0)),
            pl.BlockSpec((None, D, K * tc), lambda i, j, hit_ref: (j, 0, 0)),
            pl.BlockSpec((tb, 1), lambda i, j, hit_ref: (i, 0)),
        ],
        out_specs=pl.BlockSpec((tb, tc), lambda i, j, hit_ref: (i, j)),
    )

    out = pl.pallas_call(
        kernel,
        out_shape=jax.ShapeDtypeStruct((B_pad, C_pad), embeddings.dtype),
        grid_spec=grid_spec,
        compiler_params=pltpu.CompilerParams(
            dimension_semantics=("parallel", "parallel"),
            vmem_limit_bytes=32 * 1024 * 1024,
        ),
    )(hit, e_norm, w_tiles, labels2d)

    return out[:B, :C]


def _reference_forward(embeddings, weight, labels, *, s=50.0, m=0.5):
    """Pure-JAX reference mirroring the PyTorch module."""
    e_norm = embeddings / jnp.maximum(
        jnp.linalg.norm(embeddings, axis=-1, keepdims=True), 1e-12
    )
    wv = weight.reshape(-1, weight.shape[-1])
    wv = wv / jnp.maximum(jnp.linalg.norm(wv, axis=-1, keepdims=True), 1e-12)
    w_norm = wv.reshape(weight.shape)                              # (C, k, D)
    cosine = jnp.einsum("bd,ckd->bck", e_norm, w_norm)             # (B, C, k)
    cos_max = jnp.max(cosine, axis=2)                              # (B, C)
    theta = jnp.arccos(jnp.clip(cos_max, -1.0 + 1e-7, 1.0 - 1e-7))
    target = jnp.cos(theta + m)
    one_hot = jax.nn.one_hot(labels, weight.shape[0], dtype=cos_max.dtype)
    return s * (one_hot * target + (1.0 - one_hot) * cos_max)


if __name__ == "__main__":
    # Small shapes consistent with the module (feature_dim, num_classes, k=3),
    # chosen so the (B-tile, C-tile) grid, hit/no-hit tile paths, and padding
    # are all exercised.
    B, D, C, K = 12, 128, 500, 3
    S_SCALE, MARGIN = 50.0, 0.5

    key = jax.random.PRNGKey(0)
    k_emb, k_w, k_lbl = jax.random.split(key, 3)

    embeddings = jax.random.normal(k_emb, (B, D), dtype=jnp.float32)
    labels = jax.random.randint(k_lbl, (B,), 0, C, dtype=jnp.int32)

    # weight: (num_classes, k, feature_dim), xavier_uniform on the (C*k, D) view.
    fan_in, fan_out = D, C * K
    bound = math.sqrt(6.0 / (fan_in + fan_out))
    weight = jax.random.uniform(
        k_w, (C, K, D), dtype=jnp.float32, minval=-bound, maxval=bound
    )

    fwd = jax.jit(
        functools.partial(
            subcenter_arcface_forward, s=S_SCALE, m=MARGIN, tb=8, tc=128
        )
    )
    out = jax.block_until_ready(fwd(embeddings, weight, labels))

    ref = _reference_forward(embeddings, weight, labels, s=S_SCALE, m=MARGIN)
    np.testing.assert_allclose(np.asarray(out), np.asarray(ref), rtol=1e-4, atol=1e-4)

    print("KERNEL_OK")
</pallas_src>

<mosaic_0001>
module attributes {stable_mosaic.version = 11 : i64} {
  func.func @_subcenter_arcface_kernel(%arg0: i32, %arg1: i32, %arg2: memref<2x4xi32, #tpu.memory_space<smem>>, %arg3: memref<8x128xf32, #tpu.memory_space<vmem>>, %arg4: memref<1x128x384xf32, #tpu.memory_space<vmem>>, %arg5: memref<8x1xi32, #tpu.memory_space<vmem>>, %arg6: memref<8x128xf32, #tpu.memory_space<vmem>>) attributes {dimension_semantics = [#tpu.dimension_semantics<parallel>, #tpu.dimension_semantics<parallel>], iteration_bounds = array<i64: 2, 4>, scalar_prefetch = 1 : i64, scratch_operands = 0 : i64, tpu.core_type = #tpu.core_type<tc>, window_params = [{transform_indices = @transform_0, window_bounds = array<i64: 8, 128>}, {transform_indices = @transform_1, window_bounds = array<i64: 1, 128, 384>}, {transform_indices = @transform_2, window_bounds = array<i64: 8, 1>}, {transform_indices = @transform_3, window_bounds = array<i64: 8, 128>}]} {
    %c0 = arith.constant 0 : index
    %c0_0 = arith.constant 0 : index
    %0 = vector.load %arg3[%c0, %c0_0] : memref<8x128xf32, #tpu.memory_space<vmem>>, vector<8x128xf32>
    %c0_1 = arith.constant 0 : index
    %c0_2 = arith.constant 0 : index
    %c0_3 = arith.constant 0 : index
    %1 = vector.load %arg4[%c0_1, %c0_2, %c0_3] : memref<1x128x384xf32, #tpu.memory_space<vmem>>, vector<1x128x384xf32>
    %2 = vector.shape_cast %1 : vector<1x128x384xf32> to vector<128x384xf32>
    %cst = arith.constant dense<0.000000e+00> : vector<8x384xf32>
    %3 = tpu.matmul %0, %2, %cst {dimension_numbers = #tpu.dot_dimension_numbers<[1], [0], [0], [1], [0, 0, 1, 1], [], []>} : vector<8x128xf32>, vector<128x384xf32>, vector<8x384xf32> -> vector<8x384xf32>
    %4 = vector.extract_strided_slice %3 {offsets = [0, 0], sizes = [8, 128], strides = [1, 1]} : vector<8x384xf32> to vector<8x128xf32>
    %5 = vector.extract_strided_slice %3 {offsets = [0, 128], sizes = [8, 128], strides = [1, 1]} : vector<8x384xf32> to vector<8x128xf32>
    %6 = arith.maximumf %4, %5 : vector<8x128xf32>
    %7 = vector.extract_strided_slice %3 {offsets = [0, 256], sizes = [8, 128], strides = [1, 1]} : vector<8x384xf32> to vector<8x128xf32>
    %8 = arith.maximumf %6, %7 : vector<8x128xf32>
    %9 = arith.index_cast %arg0 : i32 to index
    %10 = arith.index_cast %arg1 : i32 to index
    %11 = memref.load %arg2[%9, %10] : memref<2x4xi32, #tpu.memory_space<smem>>
    %c0_i32 = arith.constant 0 : i32
    %12 = arith.cmpi sgt, %11, %c0_i32 : i32
    %true = arith.constant true
    %13 = arith.xori %12, %true : i1
    %14 = arith.extui %13 : i1 to i32
    %c0_i32_4 = arith.constant 0 : i32
    %15 = arith.cmpi ne, %14, %c0_i32_4 : i32
    scf.if %15 {
      %cst_6 = arith.constant 5.000000e+01 : f32
      %18 = vector.broadcast %cst_6 : f32 to vector<8x128xf32>
      %19 = arith.mulf %18, %8 : vector<8x128xf32>
      %c0_7 = arith.constant 0 : index
      %c0_8 = arith.constant 0 : index
      %20 = vector.load %arg6[%c0_7, %c0_8] : memref<8x128xf32, #tpu.memory_space<vmem>>, vector<8x128xf32>
      tpu.vector_store %arg6[%c0_7, %c0_8], %19 {strides = array<i32>} : memref<8x128xf32, #tpu.memory_space<vmem>>, vector<8x128xf32>,
    } else {
    }
    %16 = arith.extui %12 : i1 to i32
    %c0_i32_5 = arith.constant 0 : i32
    %17 = arith.cmpi ne, %16, %c0_i32_5 : i32
    scf.if %17 {
      %cst_6 = arith.constant -0.99999988 : f32
      %cst_7 = arith.constant 0.99999988 : f32
      %18 = vector.broadcast %cst_6 : f32 to vector<8x128xf32>
      %19 = arith.maximumf %18, %8 : vector<8x128xf32>
      %20 = vector.broadcast %cst_7 : f32 to vector<8x128xf32>
      %21 = arith.minimumf %20, %19 : vector<8x128xf32>
      %cst_8 = arith.constant 0.87758255 : f32
      %22 = vector.broadcast %cst_8 : f32 to vector<8x128xf32>
      %23 = arith.mulf %21, %22 : vector<8x128xf32>
      %24 = arith.mulf %21, %21 : vector<8x128xf32>
      %cst_9 = arith.constant 1.000000e+00 : f32
      %25 = vector.broadcast %cst_9 : f32 to vector<8x128xf32>
      %26 = arith.subf %25, %24 : vector<8x128xf32>
      %27 = math.sqrt %26 : vector<8x128xf32>
      %cst_10 = arith.constant 0.47942555 : f32
      %28 = vector.broadcast %cst_10 : f32 to vector<8x128xf32>
      %29 = arith.mulf %27, %28 : vector<8x128xf32>
      %30 = arith.subf %23, %29 : vector<8x128xf32>
      %c0_11 = arith.constant 0 : index
      %c0_12 = arith.constant 0 : index
      %31 = vector.load %arg5[%c0_11, %c0_12] : memref<8x1xi32, #tpu.memory_space<vmem>>, vector<8x1xi32>
      %32 = tpu.iota {dimensions = array<i32: 1>} : vector<8x128xi32>
      %c128_i32 = arith.constant 128 : i32
      %33 = arith.muli %arg1, %c128_i32 : i32
      %34 = vector.broadcast %33 : i32 to vector<8x128xi32>
      %35 = arith.addi %32, %34 : vector<8x128xi32>
      %36 = vector.broadcast %31 : vector<8x1xi32> to vector<8x128xi32>
      %37 = arith.cmpi eq, %35, %36 : vector<8x128xi32>
      %cst_13 = arith.constant 5.000000e+01 : f32
      %38 = vector.broadcast %cst_13 : f32 to vector<8x128xf32>
      %39 = arith.mulf %38, %30 : vector<8x128xf32>
      %cst_14 = arith.constant 5.000000e+01 : f32
      %40 = vector.broadcast %cst_14 : f32 to vector<8x128xf32>
      %41 = arith.mulf %40, %8 : vector<8x128xf32>
      %42 = arith.select %37, %39, %41 : vector<8x128xi1>, vector<8x128xf32>
      %c0_15 = arith.constant 0 : index
      %c0_16 = arith.constant 0 : index
      %43 = vector.load %arg6[%c0_15, %c0_16] : memref<8x128xf32, #tpu.memory_space<vmem>>, vector<8x128xf32>
      tpu.vector_store %arg6[%c0_15, %c0_16], %42 {strides = array<i32>} : memref<8x128xf32, #tpu.memory_space<vmem>>, vector<8x128xf32>,
    } else {
    }
    return
  }
  func.func @transform_0(%arg0: i32, %arg1: i32, %arg2: memref<2x4xi32, #tpu.memory_space<smem>>) -> (i32, i32) {
    %c0_i32 = arith.constant 0 : i32
    %c0_i32_0 = arith.constant 0 : i32
    return %arg0, %c0_i32 : i32, i32
  }
  func.func @transform_1(%arg0: i32, %arg1: i32, %arg2: memref<2x4xi32, #tpu.memory_space<smem>>) -> (i32, i32, i32) {
    %c0_i32 = arith.constant 0 : i32
    %c0_i32_0 = arith.constant 0 : i32
    %c0_i32_1 = arith.constant 0 : i32
    return %arg1, %c0_i32, %c0_i32_0 : i32, i32, i32
  }
  func.func @transform_2(%arg0: i32, %arg1: i32, %arg2: memref<2x4xi32, #tpu.memory_space<smem>>) -> (i32, i32) {
    %c0_i32 = arith.constant 0 : i32
    %c0_i32_0 = arith.constant 0 : i32
    return %arg0, %c0_i32 : i32, i32
  }
  func.func @transform_3(%arg0: i32, %arg1: i32, %arg2: memref<2x4xi32, #tpu.memory_space<smem>>) -> (i32, i32) {
    %c0_i32 = arith.constant 0 : i32
    return %arg0, %arg1 : i32, i32
  }
}

</mosaic_0001>

<bundles_post_ra>
// kernel: subcenter_arcface_forward.1
= control target key start
LH: loop header
LB: loop body
LE: loop exit
PB: predicated region body
PF: predicated region fallthrough
CT: control target
= control target key end

     0   :  { %s1145_s0 = inlined_call_operand.vmem [shape: s32[2,4], index: 0, kind: input, shape index: {}]   ;;  %s1146_s1 = inlined_call_operand.vmem [shape: f32[16,128], index: 1, kind: input, shape index: {}]   ;;  %s1147_s2 = inlined_call_operand.vmem [shape: f32[4,128,384], index: 2, kind: input, shape index: {}]   ;;  %s1148_s3 = inlined_call_operand.vmem [shape: s32[16,1], index: 3, kind: input, shape index: {}]   ;;  %s1149_s4 = inlined_call_operand.hbm [shape: f32[16,512], index: 4, kind: output, shape index: {}]  }
   0x1   :  { %s9_s17 = sshll.u32 %s1145_s0, 4  ;;  %s10_s17 = int_to_ptr.vmem [resolvable:$true] %s9_s17 }
   0x2   :  { %s781_s18 = scalar_lea.vmem %s10_s17, 32  ;;  %p786_p1 = scmp.lt.s32.totalorder %s10_s17, %s10_s17 }
   0x3   :  { %p782_p0 = scmp.ne.s32.totalorder %s10_s17, %s781_s18  ;;  %p787_p2 = scmp.lt.s32.totalorder %s781_s18, %s781_s18 }
   0x5   :  { %p788_p3 = por %p787_p2, %p786_p1 }
   0x7   :  { %p789_p4 = pnand %p788_p3, %p782_p0 }
   0x9   :  { %792 = shalt.err (!%p789_p4)  }
   0xa   :  { %s891_s19 = smov [#allocation3]  }
   0xb   :  { %12 = dma.vmem_to_smem %s10_s17, 32, %s891_s19, [#allocation2] }
   0xc   :  { %853 = dma.done.wait [#allocation2], 32 }
   0xd   :  { %854 = vsyncadd [#allocation2], 4294967264 }
   0xe   :  { %14 = sfence }
   0xf   :  { %15 = vsyncpa [#allocation5], 0 }
  0x10   :  { %17 = vsyncpa [#allocation5 + $0x1], 0  ;;  %s925_s20 = smov 0   ;;  %s927_s21 = smov 0  }
  0x11   :  { %s929_s0 = smov 0   ;;  %s931_s22 = smov 0  }
  0x12   :  { %s933_s23 = smov 0   ;;  %s935_s24 = smov 0  }
  0x13   :  { %s937_s25 = smov 0   ;;  %s939_s26 = smov 0  }
  0x14 LB: > { %s574_s27 = sadd.s32 4294967295, %s889_s26   ;;  %s575_s28 = sadd.s32 4294967294, %s889_s26   ;;  %s889_s26 = sphi %s939_s26, %s23_s26   ;;  %s885_s25 = sphi %s937_s25, %s1158_s25   ;;  %s881_s24 = sphi %s935_s24, %s1157_s24   ;;  %s877_s23 = sphi %s933_s23, %s1156_s23   ;;  %s873_s22 = sphi %s931_s22, %s1155_s22   ;;  %s869_s0 = sphi %s929_s0, %s1154_s0   ;;  %s865_s21 = sphi %s927_s21, %s1153_s21   ;;  %s861_s20 = sphi %s925_s20, %s1152_s20  }
  0x15   : > { %s32_s29 = sadd.s32 1, %s881_s24  ;;  %s35_s30 = sadd.s32 1, %s885_s25 }
  0x16   : > { %p33_p5 = scmp.ge.s32.totalorder %s32_s29, 4  ;;  %p132_p6 = scmp.ne.s32.totalorder %s869_s0, %s865_s21 }
  0x17   : > { %p133_p7 = scmp.eq.s32.totalorder %s574_s27, 7  ;;  %p138_p10 = scmp.ne.s32.totalorder %s865_s21, %s861_s20 }
  0x18   : > { %s1160_s29 = smov (%p33_p5, %s32_s29), 0  ;;  %s1162_s30 = smov (!%p33_p5, %s35_s30), %s885_s25 }
  0x19   : > { %s118_s5 = ssub.s32 %s881_s24, %s1160_s29  ;;  %p976_p8 = por %p133_p7, %p132_p6 }
  0x1a   : > { %p37_p9 = scmp.ge.s32.totalorder %s1162_s30, 2  ;;  %p139_p11 = scmp.eq.s32.totalorder %s575_s28, 7 }
  0x1b   : > { %p578_p12 = scmp.ge.s32.totalorder %s889_s26, 1  ;;  %p179_p0 = scmp.lt.s32.totalorder %s889_s26, 9 }
  0x1c   : > { %s1164_s30 = smov (%p37_p9, %s1162_s30), 0  ;;  %p985_p13 = por %p139_p11, %p138_p10 }
  0x1d   : > { %s117_s8 = ssub.s32 %s885_s25, %s1164_s30  ;;  %s122_s9 = sadd.s32 1, %s869_s0 }
  0x1e   : > { %s119_s10 = sor.u32 %s118_s5, %s117_s8  ;;  %p180_p1 = pnand %p578_p12, %p179_p0 }
  0x1f   : > { %p120_p2 = scmp.eq.s32.totalorder %s119_s10, 0  ;;  %s208_s12 = sand.u32 (!%p180_p1), 1, %s865_s21   ;;  %v892_v0 = vmov (!%p180_p1), 0.0|0.0   ;;  %v893_v1 = vmov (!%p180_p1), 0.0   ;;  %vm894_vm0 = vmmov (!%p180_p1), 0  }
  0x20   : > { %183 = sbr.rel (%p180_p1) target bundleno = 459 (0x1cb), region = 32  ;;  %p215_p3 = scmp.lt.s32.totalorder (!%p180_p1), %s873_s22, 3  ;;  %677 = vmatprep.subr.bf16.mxu1 (!%p180_p1), %v892_v0  ;;  %337 = vmatprep.mubr.f32.mxu0 (!%p180_p1), %v893_v1 }
  0x21   : > { %s994_s11 = scalar_select %p120_p2, %s869_s0, %s122_s9  }
  0x22   : > { %s1000_s13 = sshll.u32 (!%p180_p1), %s208_s12, 3  ;;  %p211_p4 = scmp.lt.s32.totalorder (!%p180_p1), %s877_s23, 1  ;;  %642 = vmatprep.mubr.msk.f32.mxu1 (!%p180_p1), %vm894_vm0, %v893_v1 }
  0x27   : > { %s216_s14 = scalar_select %p215_p3, %s873_s22, 3 }
  0x28   : > { %s1006_s15 = scalar_select %p211_p4, %s877_s23, 1 }
  0x29   : > { %s701_s16 = smul.u32 384, %s216_s14 }
  0x2a   : > { %s580_s27 = sshll.u32 %s1006_s15, 3  ;;  %s1085_s15 = scalar_lea.vmem [#allocation4], %s1000_s13 }
  0x2b   : > { %s1011_s19 = scalar_lea.vmem %s1147_s2, %s701_s16  ;;  %s1022_s8 = scalar_lea.vmem %s1148_s3, %s580_s27 }
  0x2c   : > { %v226_v2 = vld [vmem:[%s1011_s19 + $0x8] sm:$0xff]  ;;  %v229_v3 = vld [vmem:[%s1011_s19 + $0x20] sm:$0xff]  ;;  %v228_v6 = vld [vmem:[%s1011_s19 + $0x18] sm:$0xff]  ;;  %s214_s14 = scalar_lea.vmem %s1146_s1, %s580_s27  ;;  %s416_s16 = sshra.s32 %s873_s22, 7 }
  0x2d   : > { %v225_v4 = vld [vmem:[%s1011_s19] sm:$0xff]  ;;  %v645_v5 = vpack.c.bf16 %v229_v3, %v226_v2  ;;  %v227_v7 = vld [vmem:[%s1011_s19 + $0x10] sm:$0xff]  ;;  %v230_v8 = vld [vmem:[%s1011_s19 + $0x28] sm:$0xff]  ;;  %s418_s17 = sadd.s32 %s877_s23, %s416_s16 }
  0x2e   : > { %v647_v9 = vpack.c.bf16 %v228_v6, %v225_v4  ;;  %v678_v10 = vpack.c.bf16 %v230_v8, %v227_v7  ;;  %v232_v11 = vld [vmem:[%s1011_s19 + $0x38] sm:$0xff]  ;;  %v235_v12 = vld [vmem:[%s1011_s19 + $0x50] sm:$0xff]  ;;  %v234_v15 = vld [vmem:[%s1011_s19 + $0x48] sm:$0xff]  ;;  %s583_s18 = sshll.u32 %s418_s17, 7 }
  0x2f   : > { %v231_v13 = vld [vmem:[%s1011_s19 + $0x30] sm:$0xff]  ;;  %646 = vmatprep.subr.bf16.mxu0 %v645_v5  ;;  %v649_v14 = vpack.c.bf16 %v235_v12, %v232_v11  ;;  %v233_v16 = vld [vmem:[%s1011_s19 + $0x40] sm:$0xff]  ;;  %v236_v17 = vld [vmem:[%s1011_s19 + $0x58] sm:$0xff] }
  0x30   : > { %648 = vmatpush1.bf16.msra.mxu0 %v647_v9  ;;  %679 = vmatpush3.bf16.msra.mxu1 %v678_v10  ;;  %v651_v18 = vpack.c.bf16 %v234_v15, %v231_v13  ;;  %v681_v19 = vpack.c.bf16 %v236_v17, %v233_v16  ;;  %v238_v20 = vld [vmem:[%s1011_s19 + $0x68] sm:$0xff]  ;;  %v241_v21 = vld [vmem:[%s1011_s19 + $0x80] sm:$0xff]  ;;  %v240_v24 = vld [vmem:[%s1011_s19 + $0x78] sm:$0xff] }
  0x31   : > { %v237_v22 = vld [vmem:[%s1011_s19 + $0x60] sm:$0xff]  ;;  %650 = vmatprep.subr.bf16.mxu0 %v649_v14  ;;  %680 = vmatprep.subr.bf16.mxu1 %v892_v0  ;;  %v653_v23 = vpack.c.bf16 %v241_v21, %v238_v20  ;;  %v239_v25 = vld [vmem:[%s1011_s19 + $0x70] sm:$0xff]  ;;  %v242_v26 = vld [vmem:[%s1011_s19 + $0x88] sm:$0xff] }
  0x32   : > { %v244_v27 = vld [vmem:[%s1011_s19 + $0x98] sm:$0xff]  ;;  %v247_v28 = vld [vmem:[%s1011_s19 + $0xb0] sm:$0xff]  ;;  %v655_v29 = vpack.c.bf16 %v240_v24, %v237_v22  ;;  %v684_v30 = vpack.c.bf16 %v242_v26, %v239_v25  ;;  %v246_v33 = vld [vmem:[%s1011_s19 + $0xa8] sm:$0xff] }
  0x33   : > { %v243_v31 = vld [vmem:[%s1011_s19 + $0x90] sm:$0xff]  ;;  %v657_v32 = vpack.c.bf16 %v247_v28, %v244_v27  ;;  %v245_v34 = vld [vmem:[%s1011_s19 + $0xa0] sm:$0xff]  ;;  %v248_v35 = vld [vmem:[%s1011_s19 + $0xb8] sm:$0xff] }
  0x34   : > { %652 = vmatpush1.bf16.msra.mxu0 %v651_v18  ;;  %682 = vmatpush3.bf16.msra.mxu1 %v681_v19  ;;  %v250_v36 = vld [vmem:[%s1011_s19 + $0xc8] sm:$0xff]  ;;  %v253_v37 = vld [vmem:[%s1011_s19 + $0xe0] sm:$0xff]  ;;  %v659_v38 = vpack.c.bf16 %v246_v33, %v243_v31  ;;  %v687_v39 = vpack.c.bf16 %v248_v35, %v245_v34  ;;  %v252_v42 = vld [vmem:[%s1011_s19 + $0xd8] sm:$0xff] }
  0x35   : > { %654 = vmatprep.subr.bf16.mxu0 %v653_v23  ;;  %683 = vmatprep.subr.bf16.mxu1 %v892_v0  ;;  %v249_v40 = vld [vmem:[%s1011_s19 + $0xc0] sm:$0xff]  ;;  %v661_v41 = vpack.c.bf16 %v253_v37, %v250_v36  ;;  %v251_v43 = vld [vmem:[%s1011_s19 + $0xd0] sm:$0xff]  ;;  %v254_v44 = vld [vmem:[%s1011_s19 + $0xe8] sm:$0xff] }
  0x36   : > { %v256_v45 = vld [vmem:[%s1011_s19 + $0xf8] sm:$0xff]  ;;  %v259_v46 = vld [vmem:[%s1011_s19 + $0x110] sm:$0xff]  ;;  %v663_v47 = vpack.c.bf16 %v252_v42, %v249_v40  ;;  %v690_v48 = vpack.c.bf16 %v254_v44, %v251_v43  ;;  %v258_v51 = vld [vmem:[%s1011_s19 + $0x108] sm:$0xff] }
  0x37   : > { %v255_v49 = vld [vmem:[%s1011_s19 + $0xf0] sm:$0xff]  ;;  %v665_v50 = vpack.c.bf16 %v259_v46, %v256_v45  ;;  %v257_v52 = vld [vmem:[%s1011_s19 + $0x100] sm:$0xff]  ;;  %v260_v53 = vld [vmem:[%s1011_s19 + $0x118] sm:$0xff] }
  0x38   : > { %656 = vmatpush1.bf16.msra.mxu0 %v655_v29  ;;  %685 = vmatpush3.bf16.msra.mxu1 %v684_v30  ;;  %v262_v54 = vld [vmem:[%s1011_s19 + $0x128] sm:$0xff]  ;;  %v265_v55 = vld [vmem:[%s1011_s19 + $0x140] sm:$0xff]  ;;  %v667_v56 = vpack.c.bf16 %v258_v51, %v255_v49  ;;  %v693_v57 = vpack.c.bf16 %v260_v53, %v257_v52  ;;  %v264_v60 = vld [vmem:[%s1011_s19 + $0x138] sm:$0xff] }
  0x39   : > { %658 = vmatprep.subr.bf16.mxu0 %v657_v32  ;;  %686 = vmatprep.subr.bf16.mxu1 %v892_v0  ;;  %v261_v58 = vld [vmem:[%s1011_s19 + $0x120] sm:$0xff]  ;;  %v669_v59 = vpack.c.bf16 %v265_v55, %v262_v54  ;;  %v263_v61 = vld [vmem:[%s1011_s19 + $0x130] sm:$0xff]  ;;  %v266_v62 = vld [vmem:[%s1011_s19 + $0x148] sm:$0xff] }
  0x3a   : > { %v268_v63 = vld [vmem:[%s1011_s19 + $0x158] sm:$0xff]  ;;  %v271_v1 = vld [vmem:[%s1011_s19 + $0x170] sm:$0xff]  ;;  %v671_v2 = vpack.c.bf16 %v264_v60, %v261_v58  ;;  %v696_v3 = vpack.c.bf16 %v266_v62, %v263_v61  ;;  %v270_v6 = vld [vmem:[%s1011_s19 + $0x168] sm:$0xff] }
  0x3b   : > { %v267_v4 = vld [vmem:[%s1011_s19 + $0x150] sm:$0xff]  ;;  %v673_v5 = vpack.c.bf16 %v271_v1, %v268_v63  ;;  %v269_v7 = vld [vmem:[%s1011_s19 + $0x160] sm:$0xff]  ;;  %v272_v8 = vld [vmem:[%s1011_s19 + $0x178] sm:$0xff]  ;;  %s421_s19 = sand.u32 127, %s873_s22 }
  0x3c   : > { %660 = vmatpush1.bf16.msra.mxu0 %v659_v38  ;;  %688 = vmatpush3.bf16.msra.mxu1 %v687_v39  ;;  %v675_v9 = vpack.c.bf16 %v270_v6, %v267_v4  ;;  %v699_v10 = vpack.c.bf16 %v272_v8, %v269_v7  ;;  %v224_v11 = vld [vmem:[%s214_s14] sm:$0xff]  ;;  %s422_s28 = sadd.s32 %s583_s18, %s421_s19 }
  0x3d   : > { %662 = vmatprep.subr.bf16.mxu0 %v661_v41  ;;  %689 = vmatprep.subr.bf16.mxu1 %v892_v0  ;;  %s423_s5 = sld [smem:[#allocation3 + %s422_s28]] }
  0x40   : > { %664 = vmatpush1.bf16.msra.mxu0 %v663_v47  ;;  %691 = vmatpush3.bf16.msra.mxu1 %v690_v48 }
  0x41   : > { %666 = vmatprep.subr.bf16.mxu0 %v665_v50  ;;  %692 = vmatprep.subr.bf16.mxu1 %v892_v0 }
  0x43   : > { %p584_p5 = scmp.gt.s32.totalorder %s423_s5, 0 }
  0x44   : > { %668 = vmatpush1.bf16.msra.mxu0 %v667_v56  ;;  %694 = vmatpush3.bf16.msra.mxu1 %v693_v57 }
  0x45   : > { %670 = vmatprep.subr.bf16.mxu0 %v669_v59  ;;  %695 = vmatprep.subr.bf16.mxu1 %v892_v0 }
  0x48   : > { %672 = vmatpush1.bf16.msra.mxu0 %v671_v2  ;;  %697 = vmatpush3.bf16.msra.mxu1 %v696_v3 }
  0x49   : > { %674 = vmatprep.subr.bf16.mxu0 %v673_v5  ;;  %698 = vmatprep.subr.bf16.mxu1 %v892_v0 }
  0x4c   : > { %676 = vmatpush1.bf16.msra.mxu0 %v675_v9  ;;  %700 = vmatpush3.bf16.msra.mxu1 %v699_v10 }
  0x4f   : > { %338 = vmatmul.mubr.f32.vlgmr.msra.gmra.mrb[0].mxu0 %v224_v11  ;;  %643 = vmatmul.mubr.f32.vlgmr.msra.gmra.mrb[0].mxu1 %v224_v11 }
 0x120   : > { %428 = sbr.rel (%p584_p5) target bundleno = 299 (0x12b), region = 36 }
 0x122   : > { %v339_v12 = vpop.f32.mrb[0].mxu0  ;;  %v410_v13 = vpop.f32.mrb[0].mxu1 }
 0x123   : > { %v341_v0 = vpop.f32.mrb[1].mxu0  ;;  %v644_v14 = vpop.f32.mrb[1].mxu1 }
 0x124   : > { %v414_v15 = vmax.f32 %v339_v12, %v341_v0 }
 0x126   : > { %v415_v16 = vmax.f32 %v414_v15, %v410_v13 }
 0x128   : > { %v429_v17 = vmul.f32 50.0, %v415_v16 }
 0x12a   : > { %430 = vst [vmem:[%s1085_s15] sm:$0xff] %v429_v17 }
 0x12b PF: > { %p585_p6 = scmp.le.s32.totalorder %s423_s5, 0 }
 0x12c   : > { %v448_v18 = vld [vmem:[%s1022_s8] sm:$0xff] (!%p585_p6)  ;;  %v895_v19 = vmov (!%p585_p6), 0   ;;  %v586_v20 = vclamps-f32 (!%p585_p6), %v415_v16, 0.9999999  ;;  %v449_v28 = vlaneseq (!%p585_p6)  ;;  %s587_s13 = sshll.u32 (!%p585_p6), %s873_s22, 7  ;;  %v459_v35 = vmul.f32 (!%p585_p6), 50.0, %v415_v16 }
 0x12d   : > { %433 = sbr.rel (%p585_p6) target bundleno = 433 (0x1b1), region = 40  ;;  %778 = vset.pattern.permute.xlu0 (!%p585_p6), %v895_v19  ;;  %v452_v32 = vstv (!%p585_p6), %s587_s13 }
 0x12e   : > { %455 = vperm.xlu0 (!%p585_p6), %778, %v448_v18   ;;  %v437_v21 = vmul.f32 (!%p585_p6), %v586_v20, %v586_v20  ;;  %v436_v29 = vmul.f32 (!%p585_p6), 0.87758255, %v586_v20  ;;  %v450_v31 = vand.u32 (!%p585_p6), 127, %v449_v28 }
 0x130   : > { %v438_v22 = vsub.f32 (!%p585_p6), 1.0, %v437_v21  ;;  %v453_v34 = vadd.s32 (!%p585_p6), %v452_v32, %v450_v31 }
 0x132   : > { %779 = vrsqrt.f32 (!%p585_p6), %v438_v22  ;;  %vm441_vm1 = vcmp.eq.f32.partialorder (!%p585_p6), %v438_v22, inf  ;;  %v444_v25 = vand.u32 (!%p585_p6), 2147483648, %v438_v22  ;;  %vm443_vm2 = vcmp.eq.f32.partialorder (!%p585_p6), %v438_v22, 0.0 }
 0x13c   : > { %v780_v23 = vpop.eup %779 }
 0x13d   : > { %v440_v24 = vmul.f32 %v780_v23, %v438_v22 }
 0x13f   : > { %v442_v26 = vsel %vm441_vm1, %v438_v22, %v440_v24 }
 0x140   : > { %v445_v27 = vsel %vm443_vm2, %v444_v25, %v442_v26 }
 0x141   : > { %v446_v30 = vmul.f32 0.47942555, %v445_v27 }
 0x143   : > { %v447_v33 = vsub.f32 %v436_v29, %v446_v30 }
 0x145   : > { %v458_v36 = vmul.f32 50.0, %v447_v33 }
 0x1ad   : > { %v456_v37 = vpop.permute.xlu0 %455 }
 0x1ae   : > { %vm457_vm3 = vcmp.eq.s32.totalorder %v453_v34, %v456_v37 }
 0x1af   : > { %v460_v38 = vsel %vm457_vm3, %v458_v36, %v459_v35 }
 0x1b0   : > { %461 = vst [vmem:[%s1085_s15] sm:$0xff] %v460_v38 }
 0x1b1 PF: > { %s589_s27 = sshll.u32 %s877_s23, 2  ;;  %s478_s9 = sshll.u32 %s1085_s15, 4  ;;  %s1094_s9 = int_to_ptr.vmem [resolvable:$true] %s478_s9 }
 0x1b2   : > { %s474_s8 = sadd.s32 %s873_s22, %s589_s27  ;;  %s463_s18 = scalar_lea.sflag [#allocation5], %s208_s12 }
 0x1b3   : > { %s590_s10 = sshll.u32 %s474_s8, 7  ;;  %s793_s19 = scalar_lea.vmem %s1094_s9, 128 }
 0x1b4   : > { %s476_s17 = scalar_lea.hbm %s1149_s4, %s590_s10  ;;  %p794_p7 = scmp.ne.s32.totalorder %s1094_s9, %s793_s19 }
 0x1b5   : > { %s896_s23 = smov [#allocation4]  }
 0x1b6   : > { %p795_p9 = pnand %p794_p7, %p976_p8  ;;  %s797_s22 = sshll.u32 %s896_s23, 4  ;;  %s798_s22 = int_to_ptr.vmem [resolvable:$false] %s797_s22 }
 0x1b7   : > { %s799_s28 = scalar_lea.vmem %s798_s22, 256  ;;  %p800_p11 = scmp.lt.s32.totalorder %s1094_s9, %s798_s22 }
 0x1b8   : > { %p796_p10 = pneg %p795_p9  ;;  %p801_p12 = scmp.lt.s32.totalorder %s799_s28, %s793_s19 }
 0x1ba   : > { %p802_p0 = por %p801_p12, %p800_p11 }
 0x1bc   : > { %p803_p1 = pnand %p802_p0, %p796_p10 }
 0x1be   : > { %806 = shalt.err (!%p803_p1)
}
 0x1bf   : > { %s807_s5 = scalar_lea.hbm %s476_s17, 128  ;;  %s811_s13 = scalar_lea.hbm %s1149_s4, 1024 }
 0x1c0   : > { %p808_p2 = scmp.ne.s32.totalorder %s476_s17, %s807_s5  ;;  %p812_p5 = scmp.lt.u32.totalorder %s476_s17, %s1149_s4 }
 0x1c1   : > { %p813_p6 = scmp.lt.u32.totalorder %s811_s13, %s807_s5  ;;  %p815_p9 = scmp.lt.u32.totalorder %s807_s5, %s476_s17 }
 0x1c2   : > { %p809_p3 = pnand %p808_p2, %p976_p8 }
 0x1c3   : > { %p814_p7 = por %p813_p6, %p812_p5 }
 0x1c4   : > { %p810_p4 = pneg %p809_p3 }
 0x1c5   : > { %p816_p11 = por %p815_p9, %p814_p7 }
 0x1c7   : > { %p817_p10 = pnand %p816_p11, %p810_p4 }
 0x1c9   : > { %820 = shalt.err (!%p817_p10)
}
 0x1ca   : > { %702 = dma.vmem_to_hbm [thread:$0]  (%p976_p8), %s1094_s9, 128, %s476_s17, %s463_s18  }
 0x1cb PF: > { %p708_p12 = scmp.ge.s32.totalorder %s889_s26, 2  ;;  %s490_s10 = sand.u32 1, %s861_s20  }
 0x1cc   : > { %s491_s14 = scalar_lea.sflag [#allocation5], %s490_s10 }
 0x1cd   : > { %p705_p0 = pnand %p708_p12, %p985_p13 }
 0x1cf   : > { %856 = dma.done.wait (!%p705_p0), %s491_s14, 128  }
 0x1d0   : > { %858 = vsyncadd (!%p705_p0), %s491_s14, 4294967168  ;;  %s23_s26 = sadd.s32 1, %s889_s26   ;;  %s1152_s20 = smov %s865_s21 }
 0x1d1   : > { %p20_p1 = scmp.ge.s32.totalorder %s23_s26, 10   ;;  %s1153_s21 = smov %s869_s0 }
 0x1d2   : > { %s1154_s0 = smov %s994_s11  ;;  %s1155_s22 = smov %s881_s24 }
 0x1d3   : > { %s1156_s23 = smov %s885_s25  ;;  %s1157_s24 = smov %s1160_s29 }
 0x1d4   : > { %s1158_s25 = smov %s1164_s30  ;;  %22 = sbr.rel (!%p20_p1) target bundleno = 20 (0x14), region = 81 }
 0x1db   :  { %496 = vsyncpa [#allocation5], 1 }
 0x1dc   :  { %498 = vsyncpa [#allocation5 + $0x1], 1 }

</bundles_post_ra>
